<compile_context>
chip_gen: v7x
topology: tpu7x:2x2x1
jax: 0.10.0
libtpu: 0.0.40
codegen_flags: <defaults>
</compile_context>

<pallas_src>
import functools

import jax
import jax.numpy as jnp
from jax import lax
from jax.experimental import pallas as pl
from jax.experimental.pallas import tpu as pltpu


# ---------------------------------------------------------------------------
# Chip-aware configuration
# ---------------------------------------------------------------------------

def _chip_config():
    """Returns (per-step VMEM budget, scoped-vmem limit to request,
    minimum grid steps, prefer-even-step-count)."""
    kind = ""
    try:
        kind = jax.devices()[0].device_kind.lower()
    except Exception:  # pragma: no cover - defensive
        pass
    # Conservative defaults (unknown chips / interpret mode).
    budget, vmem_limit, min_steps, prefer_even = 8 << 20, None, 1, False
    if "v7" in kind or "7x" in kind:
        # 3.2 TB/s HBM -> amortize the ~0.35us/step overhead with big slabs,
        # but respect the 64 MiB physical VMEM (keep working set <= 32 MiB).
        budget, vmem_limit = 24 << 20, 32 << 20
        min_steps, prefer_even = 4, True          # 2 TensorCores / chip
    elif "v6" in kind:
        budget, vmem_limit = 20 << 20, 32 << 20   # within default scoped VMEM
    elif "v5p" in kind or "v4" in kind:
        budget = 16 << 20
        min_steps, prefer_even = 4, True          # megacore: 2 TensorCores
    elif "v5" in kind:                            # v5e / v5 lite
        budget = 10 << 20                         # 16 MiB default scoped VMEM
    return budget, vmem_limit, min_steps, prefer_even


# ---------------------------------------------------------------------------
# Small helpers
# ---------------------------------------------------------------------------

def _round_up(x, m):
    return -(-x // m) * m


def _cdiv(a, b):
    return -(-a // b)


def _divisors(n):
    out = set()
    i = 1
    while i * i <= n:
        if n % i == 0:
            out.add(i)
            out.add(n // i)
        i += 1
    return out


def _sublane_tile(dtype):
    # Sublane packing of the second-to-last block dim: 8 (32-bit), 16 (16-bit),
    # 32 (8-bit).
    return max(8, 32 // jnp.dtype(dtype).itemsize)


def _pick_lane_tile(total, per_lane_bytes, budget, allow_full_extent):
    """Largest lane tile (multiple of 128, or the full extent when allowed)
    whose double-buffered footprint fits the budget."""
    lane_cap = max(128, (budget // max(per_lane_bytes, 1)) // 128 * 128)
    if allow_full_extent and total <= lane_cap:
        return total                      # one full-extent block, no partial tiles
    if total % 128 == 0:
        fits = [128 * d for d in _divisors(total // 128) if 128 * d <= lane_cap]
        if fits:
            return max(fits)              # evenly-dividing lane-dense tile
    # Non-dividing tile -> cdiv grid with a bounded (partial) final tile.
    return min(lane_cap, max(128, (total // 128) * 128))


def _pick_rows_fold(rows, per_row_bytes, budget, lane_steps, min_steps, prefer_even):
    """Largest divisor of `rows` that fits the budget while keeping enough
    (and, on multi-core chips, evenly balanced) grid steps."""
    divs = sorted(_divisors(rows), reverse=True)
    fits = [d for d in divs if d * per_row_bytes <= budget] or [1]

    def steps(d):
        return (rows // d) * lane_steps

    if prefer_even:
        cands = [d for d in fits if steps(d) >= min_steps and steps(d) % 2 == 0]
        if cands:
            return cands[0]
    cands = [d for d in fits if steps(d) >= min_steps]
    if cands:
        return cands[0]
    return fits[0]


# ---------------------------------------------------------------------------
# Kernels (pure slab copies; this op is HBM-bound)
# ---------------------------------------------------------------------------

def _copy_flat_kernel(x_ref, s_ref, o_ref):
    # x_ref/s_ref: (R, 1, tL); o_ref: (R, 2, tL).  Lane-dense slab copy.
    o_ref[:, 0:1, :] = x_ref[...]
    o_ref[:, 1:2, :] = s_ref[...]


def _copy_crop_kernel(x_ref, s_ref, o_ref, *, g):
    # Crop (Tx >= Ts) already handled by X's index_map; both halves are slabs.
    o_ref[:, :g, :] = x_ref[...]
    o_ref[:, g:, :] = s_ref[...]


def _copy_pad_masked_kernel(x_ref, s_ref, o_ref, *, g, t_tile, t_x):
    # Right-zero-pad with X tiled along time (Tx >= t_tile).  The X block index
    # is clamped in the index_map; lanes at/after Tx are zeroed here.
    t = pl.program_id(1)
    lane = lax.broadcasted_iota(jnp.int32, x_ref.shape, 2)
    valid = (t * t_tile + lane) < t_x
    x = x_ref[...]
    o_ref[:, :g, :] = jnp.where(valid, x, jnp.zeros_like(x))
    o_ref[:, g:, :] = s_ref[...]


def _copy_pad_head_kernel(x_ref, s_ref, o_ref, *, g, t_x):
    # Right-zero-pad where all of X lives inside time-tile 0 (Tx < t_tile).
    t = pl.program_id(1)
    o_ref[:, :g, :] = jnp.zeros((o_ref.shape[0], g, o_ref.shape[2]), o_ref.dtype)

    @pl.when(t == 0)
    def _():
        o_ref[:, :g, :t_x] = x_ref[...]

    o_ref[:, g:, :] = s_ref[...]


def _copy_small_kernel(x_ref, s_ref, o_ref, *, g, t_s):
    # Ts < 128 fallback: tiny full-extent blocks, crop/pad via static stores.
    t_xb = x_ref.shape[2]
    if t_xb >= t_s:      # crop
        o_ref[:, :g, :] = x_ref[:, :, :t_s]
    else:                # pad
        o_ref[:, :g, :t_xb] = x_ref[...]
        o_ref[:, :g, t_xb:] = jnp.zeros(
            (o_ref.shape[0], g, t_s - t_xb), o_ref.dtype
        )
    o_ref[:, g:, :] = s_ref[...]


# ---------------------------------------------------------------------------
# Wrapper
# ---------------------------------------------------------------------------

def _launch(kernel, grid, in_specs, out_spec, out_shape, dim_sem, vmem_limit):
    return pl.pallas_call(
        kernel,
        out_shape=out_shape,
        grid_spec=pltpu.PrefetchScalarGridSpec(
            num_scalar_prefetch=0,
            grid=grid,
            in_specs=in_specs,
            out_specs=out_spec,
        ),
        compiler_params=pltpu.CompilerParams(
            dimension_semantics=dim_sem,
            vmem_limit_bytes=vmem_limit,
        ),
    )


def concat_skip_connect(X, state, groups: int = 1):
    """X: (B, C, Tx), state: (B, C, Ts) -> (B, 2*C, Ts)  (NCL layout)."""
    B, C, Tx = X.shape
    Bs, Cs, Ts = state.shape
    if B != Bs:
        raise ValueError("batch mismatch")
    if C != Cs:
        raise ValueError("skip connection assumes equal channel counts")
    if X.dtype != state.dtype:
        raise TypeError("X and state must have the same dtype")
    if groups != 1 and C % groups:
        raise ValueError(
            "Number of channels in input tensor {} cannot be divided "
            "evenly into {} groups".format(C, groups)
        )

    g = C if groups == 1 else groups
    n_chunks = C // g
    rows = B * n_chunks
    itemsize = jnp.dtype(X.dtype).itemsize
    sub = _sublane_tile(X.dtype)
    budget, chip_vmem_limit, min_steps, prefer_even = _chip_config()

    def finalize_vmem_limit(est_bytes):
        limit = chip_vmem_limit
        default_scoped = limit if limit is not None else 16 << 20
        if est_bytes + (2 << 20) > default_scoped:
            # TODO(synk): for enormous per-row channel counts a channel-tile
            # grid axis would be better than raising the scoped-VMEM limit.
            limit = min(est_bytes + (4 << 20), 48 << 20)
        return limit

    # ------------------------- flattened path (Tx == Ts) --------------------
    if Tx == Ts:
        L = g * Ts
        Xf = X.reshape(rows, 1, L)          # contiguous -> free reshape
        Sf = state.reshape(rows, 1, L)
        per_lane = 2 * 3 * sub * itemsize   # x + s + out blocks, double-buffered
        tL = _pick_lane_tile(L, per_lane, budget, allow_full_extent=True)
        n_l = _cdiv(L, tL)
        per_row = 2 * 3 * sub * _round_up(tL, 128) * itemsize
        R = _pick_rows_fold(rows, per_row, budget, n_l, min_steps, prefer_even)
        out = _launch(
            _copy_flat_kernel,
            grid=(rows // R, n_l),
            in_specs=[pl.BlockSpec((R, 1, tL), lambda r, l: (r, 0, l)),
                      pl.BlockSpec((R, 1, tL), lambda r, l: (r, 0, l))],
            out_spec=pl.BlockSpec((R, 2, tL), lambda r, l: (r, 0, l)),
            out_shape=jax.ShapeDtypeStruct((rows, 2, L), X.dtype),
            dim_sem=("parallel", "parallel"),
            vmem_limit=finalize_vmem_limit(R * per_row),
        )(Xf, Sf)
        return out.reshape(B, 2 * C, Ts)

    Xr = X.reshape(rows, g, Tx)
    Sr = state.reshape(rows, g, Ts)

    # -------------------- time-tiled path (Tx != Ts, Ts >= 128) -------------
    if Ts >= 128:
        per_lane = 2 * (2 * _round_up(g, sub) + _round_up(2 * g, sub)) * itemsize
        tT = _pick_lane_tile(Ts, per_lane, budget, allow_full_extent=False)
        n_t = _cdiv(Ts, tT)
        per_row = per_lane * tT
        R = _pick_rows_fold(rows, per_row, budget, n_t, min_steps, prefer_even)

        if Tx >= Ts:
            # Crop: the (Tx - Ts) tail is never DMA'd (stays in the index_map).
            kernel = functools.partial(_copy_crop_kernel, g=g)
            x_blk_t = tT
            x_index = lambda r, t: (r, 0, t)
        elif Tx >= tT:
            # Pad, X tiled: clamp the block index, mask the invalid lanes.
            x_last = (Tx - 1) // tT
            kernel = functools.partial(
                _copy_pad_masked_kernel, g=g, t_tile=tT, t_x=Tx)
            x_blk_t = tT
            x_index = lambda r, t: (r, 0, jnp.minimum(t, x_last))
        else:
            # Pad, X fits entirely in the first time tile.
            kernel = functools.partial(_copy_pad_head_kernel, g=g, t_x=Tx)
            x_blk_t = Tx
            x_index = lambda r, t: (r, 0, 0)

        out = _launch(
            kernel,
            grid=(rows // R, n_t),
            in_specs=[pl.BlockSpec((R, g, x_blk_t), x_index),
                      pl.BlockSpec((R, g, tT), lambda r, t: (r, 0, t))],
            out_spec=pl.BlockSpec((R, 2 * g, tT), lambda r, t: (r, 0, t)),
            out_shape=jax.ShapeDtypeStruct((rows, 2 * g, Ts), X.dtype),
            dim_sem=("parallel", "parallel"),
            vmem_limit=finalize_vmem_limit(R * per_row),
        )(Xr, Sr)
        return out.reshape(B, 2 * C, Ts)

    # ------------------- small fallback (Ts < 128, Tx != Ts) ----------------
    if Tx > Ts and Tx >= 128:
        x_blk_t = 128                       # do not DMA the whole crop tail
    else:
        x_blk_t = Tx
    per_row = 2 * (
        _round_up(g, sub) * (_round_up(x_blk_t, 128) + _round_up(Ts, 128))
        + _round_up(2 * g, sub) * _round_up(Ts, 128)
    ) * itemsize
    R = _pick_rows_fold(rows, per_row, budget, 1, min_steps, prefer_even)
    out = _launch(
        functools.partial(_copy_small_kernel, g=g, t_s=Ts),
        grid=(rows // R,),
        in_specs=[pl.BlockSpec((R, g, x_blk_t), lambda r: (r, 0, 0)),
                  pl.BlockSpec((R, g, Ts), lambda r: (r, 0, 0))],
        out_spec=pl.BlockSpec((R, 2 * g, Ts), lambda r: (r, 0, 0)),
        out_shape=jax.ShapeDtypeStruct((rows, 2 * g, Ts), X.dtype),
        dim_sem=("parallel",),
        vmem_limit=finalize_vmem_limit(R * per_row),
    )(Xr, Sr)
    return out.reshape(B, 2 * C, Ts)


# ---------------------------------------------------------------------------
# Pure-JAX reference (matches the PyTorch module with right-crop/right-pad)
# ---------------------------------------------------------------------------

def _reference(X, state, groups):
    B, C, Tx = X.shape
    Ts = state.shape[-1]
    if Tx >= Ts:
        Xm = X[:, :, :Ts]
    else:
        Xm = jnp.pad(X, ((0, 0), (0, 0), (0, Ts - Tx)))
    if groups == 1:
        return jnp.concatenate([Xm, state], axis=1)
    xg = Xm.reshape(B, C // groups, groups, Ts)
    sg = state.reshape(B, C // groups, groups, Ts)
    return jnp.stack([xg, sg], axis=2).reshape(B, 2 * C, Ts)


if __name__ == "__main__":
    key = jax.random.PRNGKey(0)
    keys = jax.random.split(key, 14)

    def check(X, S, groups, name):
        out = jax.block_until_ready(concat_skip_connect(X, S, groups=groups))
        ref = _reference(X, S, groups)
        assert out.shape == ref.shape, name
        assert jnp.allclose(out, ref), name

    # Small fallback path: crop (Tx > Ts < 128), grouped + plain.
    X = jax.random.normal(keys[0], (2, 4, 20), dtype=jnp.float32)
    S = jax.random.normal(keys[1], (2, 4, 16), dtype=jnp.float32)
    check(X, S, 2, "small crop grouped")
    check(X, S, 1, "small crop plain")

    # Small fallback path: pad (Tx < Ts < 128).
    Xp = jax.random.normal(keys[2], (2, 4, 12), dtype=jnp.float32)
    Sp = jax.random.normal(keys[3], (2, 4, 16), dtype=jnp.float32)
    check(Xp, Sp, 1, "small pad")

    # Flattened path: Tx == Ts (small, non-128-multiple Ts -> lane axis g*Ts).
    Xf = jax.random.normal(keys[4], (2, 4, 48), dtype=jnp.float32)
    Sf = jax.random.normal(keys[5], (2, 4, 48), dtype=jnp.float32)
    check(Xf, Sf, 1, "flat equal-length")
    check(Xf, Sf, 2, "flat equal-length grouped")

    # Tiled crop path: 128-multiple Ts, Tx > Ts, grouped.
    Xt = jax.random.normal(keys[6], (2, 8, 320), dtype=jnp.float32)
    St = jax.random.normal(keys[7], (2, 8, 256), dtype=jnp.float32)
    check(Xt, St, 2, "tiled crop 128-multiple")

    # Tiled crop path: non-128-multiple Ts (cdiv grid, partial final tile).
    Xc = jax.random.normal(keys[8], (2, 4, 400), dtype=jnp.float32)
    Sc = jax.random.normal(keys[9], (2, 4, 300), dtype=jnp.float32)
    check(Xc, Sc, 1, "tiled crop non-128")

    # Tiled pad path, masked kernel: tT <= Tx < Ts (non-128-multiple Ts).
    Xm = jax.random.normal(keys[10], (2, 4, 280), dtype=jnp.float32)
    Sm = jax.random.normal(keys[11], (2, 4, 300), dtype=jnp.float32)
    check(Xm, Sm, 2, "tiled pad masked")

    # Tiled pad path, head kernel: Tx < tT <= Ts.
    Xh = jax.random.normal(keys[12], (2, 4, 100), dtype=jnp.float32)
    Sh = jax.random.normal(keys[13], (2, 4, 256), dtype=jnp.float32)
    check(Xh, Sh, 1, "tiled pad head")

    print("KERNEL_OK")
</pallas_src>

<mosaic_0001>
module attributes {stable_mosaic.version = 11 : i64} {
  func.func @_copy_small_kernel(%arg0: i32, %arg1: memref<4x2x20xf32, #tpu.memory_space<vmem>>, %arg2: memref<4x2x16xf32, #tpu.memory_space<vmem>>, %arg3: memref<4x4x16xf32, #tpu.memory_space<vmem>>) attributes {dimension_semantics = [#tpu.dimension_semantics<parallel>], iteration_bounds = array<i64: 1>, scalar_prefetch = 0 : i64, scratch_operands = 0 : i64, tpu.core_type = #tpu.core_type<tc>, window_params = [{transform_indices = @transform_0, window_bounds = array<i64: 4, 2, 20>}, {transform_indices = @transform_1, window_bounds = array<i64: 4, 2, 16>}, {transform_indices = @transform_2, window_bounds = array<i64: 4, 4, 16>}]} {
    %c0 = arith.constant 0 : index
    %c0_0 = arith.constant 0 : index
    %c0_1 = arith.constant 0 : index
    %0 = vector.load %arg1[%c0, %c0_0, %c0_1] : memref<4x2x20xf32, #tpu.memory_space<vmem>>, vector<4x2x16xf32>
    %c0_2 = arith.constant 0 : index
    %c0_3 = arith.constant 0 : index
    %c0_4 = arith.constant 0 : index
    %1 = vector.load %arg3[%c0_2, %c0_3, %c0_4] : memref<4x4x16xf32, #tpu.memory_space<vmem>>, vector<4x2x16xf32>
    tpu.vector_store %arg3[%c0_2, %c0_3, %c0_4], %0 {strides = array<i32>} : memref<4x4x16xf32, #tpu.memory_space<vmem>>, vector<4x2x16xf32>,
    %c0_5 = arith.constant 0 : index
    %c0_6 = arith.constant 0 : index
    %c0_7 = arith.constant 0 : index
    %2 = vector.load %arg2[%c0_5, %c0_6, %c0_7] : memref<4x2x16xf32, #tpu.memory_space<vmem>>, vector<4x2x16xf32>
    %c0_8 = arith.constant 0 : index
    %c2 = arith.constant 2 : index
    %c0_9 = arith.constant 0 : index
    %3 = vector.load %arg3[%c0_8, %c2, %c0_9] : memref<4x4x16xf32, #tpu.memory_space<vmem>>, vector<4x2x16xf32>
    tpu.vector_store %arg3[%c0_8, %c2, %c0_9], %2 {strides = array<i32>} : memref<4x4x16xf32, #tpu.memory_space<vmem>>, vector<4x2x16xf32>,
    return
  }
  func.func @transform_0(%arg0: i32) -> (i32, i32, i32) {
    %c0_i32 = arith.constant 0 : i32
    %c0_i32_0 = arith.constant 0 : i32
    %c0_i32_1 = arith.constant 0 : i32
    return %arg0, %c0_i32, %c0_i32_0 : i32, i32, i32
  }
  func.func @transform_1(%arg0: i32) -> (i32, i32, i32) {
    %c0_i32 = arith.constant 0 : i32
    %c0_i32_0 = arith.constant 0 : i32
    %c0_i32_1 = arith.constant 0 : i32
    return %arg0, %c0_i32, %c0_i32_0 : i32, i32, i32
  }
  func.func @transform_2(%arg0: i32) -> (i32, i32, i32) {
    %c0_i32 = arith.constant 0 : i32
    %c0_i32_0 = arith.constant 0 : i32
    %c0_i32_1 = arith.constant 0 : i32
    return %arg0, %c0_i32, %c0_i32_0 : i32, i32, i32
  }
}

</mosaic_0001>

<bundles_post_ra>
// kernel: tpu_custom_call.1
= control target key start
LH: loop header
LB: loop body
LE: loop exit
PB: predicated region body
PF: predicated region fallthrough
CT: control target
= control target key end

     0   :  { %7 = vsyncpa [#allocation3], 0  ;;  %s220_s0 = inlined_call_operand.hbm [shape: f32[4,2,20], index: 0, kind: input, shape index: {}]   ;;  %s221_s1 = inlined_call_operand.hbm [shape: f32[4,2,16], index: 1, kind: input, shape index: {}]   ;;  %s222_s2 = inlined_call_operand.hbm [shape: f32[4,4,16], index: 2, kind: output, shape index: {}]  }
   0x1   :  { %8 = vsyncpa [#allocation6], 0 }
   0x2   :  { %9 = vsyncpa [#allocation4], 0  ;;  %s154_s9 = smov [#allocation2]   ;;  %s82_s13 = scalar_lea.hbm %s220_s0, 128 }
   0x3   :  { %s15_s10 = sshll.u32 %s154_s9, 4  ;;  %p83_p0 = scmp.ne.s32.totalorder %s220_s0, %s82_s13  ;;  %s16_s10 = int_to_ptr.vmem [resolvable:$true] %s15_s10 }
   0x4   :  { %p86_p1 = scmp.lt.u32.totalorder %s82_s13, %s220_s0 }
   0x6   :  { %p88_p2 = pnand %p86_p1, %p83_p0 }
   0x8   :  { %91 = shalt.err (!%p88_p2)
}
   0x9   :  { %s92_s18 = scalar_lea.vmem %s16_s10, 128  ;;  %p97_p4 = scmp.lt.s32.totalorder %s16_s10, %s16_s10 }
   0xa   :  { %p93_p3 = scmp.ne.s32.totalorder %s16_s10, %s92_s18  ;;  %p98_p5 = scmp.lt.s32.totalorder %s92_s18, %s92_s18 }
   0xc   :  { %p99_p6 = por %p98_p5, %p97_p4 }
   0xe   :  { %p100_p7 = pnand %p99_p6, %p93_p3 }
  0x10   :  { %103 = shalt.err (!%p100_p7)
}
  0x11   :  { %s155_s19 = smov 32   ;;  %s156_s20 = smov 2  }
  0x12   :  { %21 = dma.hbm_to_vmem [thread:$0]  %s220_s0, 128, %s16_s10, [#allocation3], %s155_s19, %s155_s19, %s156_s20  }
  0x13   :  { %s157_s23 = smov [#allocation5]   ;;  %s104_s27 = scalar_lea.hbm %s221_s1, 128 }
  0x14   :  { %s27_s24 = sshll.u32 %s157_s23, 4  ;;  %p105_p8 = scmp.ne.s32.totalorder %s221_s1, %s104_s27  ;;  %s28_s24 = int_to_ptr.vmem [resolvable:$true] %s27_s24 }
  0x15   :  { %p108_p9 = scmp.lt.u32.totalorder %s104_s27, %s221_s1 }
  0x17   :  { %p110_p10 = pnand %p108_p9, %p105_p8 }
  0x19   :  { %113 = shalt.err (!%p110_p10)
}
  0x1a   :  { %s114_s4 = scalar_lea.vmem %s28_s24, 128  ;;  %p119_p12 = scmp.lt.s32.totalorder %s28_s24, %s28_s24 }
  0x1b   :  { %p115_p11 = scmp.ne.s32.totalorder %s28_s24, %s114_s4  ;;  %p120_p13 = scmp.lt.s32.totalorder %s114_s4, %s114_s4 }
  0x1d   :  { %p121_p0 = por %p120_p13, %p119_p12 }
  0x1f   :  { %p122_p1 = pnand %p121_p0, %p115_p11 }
  0x21   :  { %125 = shalt.err (!%p122_p1)
}
  0x22   :  { %33 = dma.hbm_to_vmem [thread:$0]  %s221_s1, 128, %s28_s24, [#allocation6], %s155_s19, %s155_s19, %s156_s20  }
  0x23   :  { %148 = dma.done.wait [#allocation3], 128  }
  0x24   :  { %149 = vsyncadd [#allocation3], 4294967168 }
  0x25   :  { %150 = dma.done.wait [#allocation6], 128  }
  0x26   :  { %151 = vsyncadd [#allocation6], 4294967168  ;;  %vm44_vm0 = vcmask 123904   ;;  %s158_s6 = smov [#allocation7]   ;;  %v40_v0 = vld [vmem:[#allocation2] sm:$0x3] }
  0x27   :  { %s62_s7 = sshll.u32 %s158_s6, 4  ;;  %v41_v1 = vld [vmem:[#allocation2 + $0x2] sm:$0x3]  ;;  %v42_v2 = vld [vmem:[#allocation2 + $0x4] sm:$0x3]  ;;  %s63_s7 = int_to_ptr.vmem [resolvable:$true] %s62_s7 }
  0x28   :  { %45 = vst.msk [vmem:[#allocation7] sm:$0x3] %vm44_vm0, %v40_v0  ;;  %46 = vst.msk [vmem:[#allocation7 + $0x4] sm:$0x3] %vm44_vm0, %v41_v1  ;;  %v43_v3 = vld [vmem:[#allocation2 + $0x6] sm:$0x3]  ;;  %p131_p3 = scmp.lt.s32.totalorder %s63_s7, %s63_s7 }
  0x29   :  { %47 = vst.msk [vmem:[#allocation7 + $0x8] sm:$0x3] %vm44_vm0, %v42_v2  ;;  %v49_v4 = vld [vmem:[#allocation5] sm:$0x3]  ;;  %v50_v5 = vld [vmem:[#allocation5 + $0x2] sm:$0x3] }
  0x2a   :  { %48 = vst.msk [vmem:[#allocation7 + $0xc] sm:$0x3] %vm44_vm0, %v43_v3  ;;  %53 = vst.msk [vmem:[#allocation7 + $0x2] sm:$0x3] %vm44_vm0, %v49_v4  ;;  %v51_v6 = vld [vmem:[#allocation5 + $0x4] sm:$0x3] }
  0x2b   :  { %54 = vst.msk [vmem:[#allocation7 + $0x6] sm:$0x3] %vm44_vm0, %v50_v5  ;;  %v52_v7 = vld [vmem:[#allocation5 + $0x6] sm:$0x3]  ;;  %55 = vst.msk [vmem:[#allocation7 + $0xa] sm:$0x3] %vm44_vm0, %v51_v6 }
  0x2c   :  { %56 = vst.msk [vmem:[#allocation7 + $0xe] sm:$0x3] %vm44_vm0, %v52_v7  ;;  %s126_s1 = scalar_lea.vmem %s63_s7, 256 }
  0x2d   :  { %p127_p2 = scmp.ne.s32.totalorder %s63_s7, %s126_s1  ;;  %p132_p4 = scmp.lt.s32.totalorder %s126_s1, %s126_s1 }
  0x2f   :  { %p133_p5 = por %p132_p4, %p131_p3 }
  0x31   :  { %p134_p6 = pnand %p133_p5, %p127_p2 }
  0x33   :  { %137 = shalt.err (!%p134_p6)
}
  0x34   :  { %s138_s10 = scalar_lea.hbm %s222_s2, 256 }
  0x35   :  { %p139_p7 = scmp.ne.s32.totalorder %s222_s2, %s138_s10  ;;  %p142_p8 = scmp.lt.u32.totalorder %s138_s10, %s222_s2 }
  0x37   :  { %p144_p9 = pnand %p142_p8, %p139_p7 }
  0x39   :  { %147 = shalt.err (!%p144_p9)
}
  0x3a   :  { %s159_s15 = smov 64   ;;  %s160_s16 = smov 4  }
  0x3b   :  { %68 = dma.vmem_to_hbm [thread:$0]  %s63_s7, 256, %s222_s2, [#allocation4], %s159_s15, %s159_s15, %s160_s16  }
  0x3c   :  { %152 = dma.done.wait [#allocation4], 256  }
  0x3d   :  { %153 = vsyncadd [#allocation4], 4294967040 }
  0x3e   :  { %72 = vsyncpa [#allocation3], 1 }
  0x3f   :  { %73 = vsyncpa [#allocation6], 1 }
  0x40   :  { %74 = vsyncpa [#allocation4], 1 }

</bundles_post_ra>
